<compile_context>
chip_gen: v6e
topology: v6e:2x2x1
jax: 0.10.0
libtpu: 0.0.40
codegen_flags: <defaults>
</compile_context>

<pallas_src>
import math

import jax
import jax.numpy as jnp
from jax import lax
from jax.experimental import pallas as pl
from jax.experimental.pallas import tpu as pltpu


def make_self_attention(embed_size: int, heads: int, seq_len: int, batch: int,
                        compute_dtype=jnp.bfloat16):
    """compute_dtype=bf16 (default) uses the bf16-native MXU path on all TPU gens;
    pass jnp.float32 for tighter numerics (multi-pass MXU)."""
    E, H, L, N = embed_size, heads, seq_len, batch
    D = E // H
    assert D * H == E, "Embed size needs to be a multiple of heads"
    NL = N * L
    PROJ_W = (2 + H) * E          # [K|Q head-major] (2E) + [V'_0..V'_{H-1}] (H*E)
    inv_sqrt_e = 1.0 / math.sqrt(E)
    cd = compute_dtype

    def kernel(x_ref, bias_ref, wf_ref, bo_ref, o_ref):
        # ---- fused projection: ONE MXU matmul ------------------------------------
        # x_ref  : (NL, 3E) = [keys | queries | values] concatenated along lanes
        # wf_ref : (3E, (2+H)E) = [K/Q head-major block | blockdiag-free Wv@Wo block]
        proj = jnp.dot(x_ref[...].astype(cd), wf_ref[...].astype(cd),
                       preferred_element_type=jnp.float32)          # (NL, (2+H)E)

        # Additive bias (user mask + cross-batch -1e20), loaded once, reused per head.
        bias = bias_ref[...]                                         # (NL, NL) f32

        # Accumulator starts at the fc_out bias (hoisted broadcast).
        out = jnp.broadcast_to(bo_ref[...], (NL, E)).astype(jnp.float32)

        # Static unroll over heads; per head: one (NL,NL) scores matmul and one
        # (NL,NL)x(NL,E) context matmul (W_o already folded into V').
        for h in range(H):
            k_h = proj[:, h * 2 * D: h * 2 * D + D]                  # (NL, D)
            q_h = proj[:, h * 2 * D + D: (h + 1) * 2 * D]            # (NL, D), pre /sqrt(E)
            # scores[i, j] = sum_d q_h[i, d] * k_h[j, d]
            scores = lax.dot_general(
                q_h.astype(cd), k_h.astype(cd),
                (((1,), (1,)), ((), ())),
                preferred_element_type=jnp.float32)                  # (NL, NL)
            logits = scores + bias
            m = jnp.max(logits, axis=-1, keepdims=True)
            p = jnp.exp(logits - m)
            denom = jnp.sum(p, axis=-1, keepdims=True)
            attn = p * pl.reciprocal(denom, approx=True)             # EUP vrcp (free slot)

            vph = proj[:, 2 * E + h * E: 2 * E + (h + 1) * E]        # (NL, E) = x_v @ Wvo_h
            out = out + jnp.dot(attn.astype(cd), vph.astype(cd),
                                preferred_element_type=jnp.float32)  # (NL, E)

        o_ref[...] = out.astype(o_ref.dtype)

    attn_call = pl.pallas_call(
        kernel,
        out_shape=jax.ShapeDtypeStruct((NL, E), jnp.float32),
        grid=(1,),
        in_specs=[
            pl.BlockSpec((NL, 3 * E), lambda i: (0, 0)),       # [K|Q|V] inputs
            pl.BlockSpec((NL, NL), lambda i: (0, 0)),          # additive mask bias (f32)
            pl.BlockSpec((3 * E, PROJ_W), lambda i: (0, 0)),   # fused projection weight
            pl.BlockSpec((1, E), lambda i: (0, 0)),            # fc_out bias
        ],
        out_specs=pl.BlockSpec((NL, E), lambda i: (0, 0)),
        compiler_params=pltpu.CompilerParams(
            dimension_semantics=("arbitrary",)),
    )

    def forward(values, keys, queries, mask, params):
        wk, wv, wq, wo, bo = params
        # ---- fused weight, head-major columns (all cheap XLA ops, fused under jit) --
        wqs = wq * inv_sqrt_e
        zer = jnp.zeros((E, H, D), wk.dtype)
        # rows 0:E  (keys input)    -> K_h columns of each [K_h | Q_h] chunk
        # rows E:2E (queries input) -> Q_h columns (pre-scaled by 1/sqrt(E))
        kq_rows_k = jnp.concatenate([wk.reshape(E, H, D), zer], axis=2).reshape(E, 2 * E)
        kq_rows_q = jnp.concatenate([zer, wqs.reshape(E, H, D)], axis=2).reshape(E, 2 * E)
        # rows 2E:3E (values input) -> V'_h columns, Wvo_h = Wv_block_h @ Wo_block_h
        wvo = jnp.einsum('ehd,hdf->ehf', wv.reshape(E, H, D),
                         wo.reshape(H, D, E)).reshape(E, H * E)
        zeros_he = jnp.zeros((E, H * E), wk.dtype)
        w_fused = jnp.concatenate([
            jnp.concatenate([kq_rows_k, zeros_he], axis=1),
            jnp.concatenate([kq_rows_q, zeros_he], axis=1),
            jnp.concatenate([jnp.zeros((E, 2 * E), wk.dtype), wvo], axis=1),
        ], axis=0)                                                   # (3E, (2+H)E)

        x_cat = jnp.concatenate([keys, queries, values], axis=-1).reshape(NL, 3 * E)

        # ---- single (NL, NL) additive bias: user mask + cross-batch blocks ---------
        bi = jnp.arange(NL) // L
        li = jnp.arange(NL) % L
        same_b = bi[:, None] == bi[None, :]
        if mask is None:
            vis = same_b
        else:
            m = jnp.asarray(mask)
            if m.ndim == 4:
                # TODO(synk): per-head masks are collapsed to head 0 (typical
                # causal/padding masks are head-independent, as in this test).
                m = m[:, 0]
            m = jnp.broadcast_to(m, (N, L, L))
            user_vis = (m != 0)[bi[:, None], li[:, None], li[None, :]]  # (NL, NL)
            vis = same_b & user_vis
        bias = jnp.where(vis, jnp.float32(0.0), jnp.float32(-1e20))

        out = attn_call(x_cat, bias, w_fused, bo.reshape(1, E))      # (NL, E)
        return out.reshape(N, L, E)

    return jax.jit(forward)


def reference_forward(values, keys, queries, mask, params, embed_size, heads):
    """Plain-JAX reference mirroring the PyTorch module exactly (f32)."""
    wk, wv, wq, wo, bo = params
    N, L, E = queries.shape
    H, D = heads, embed_size // heads
    k = keys @ wk
    v = values @ wv
    q = queries @ wq
    k = k.reshape(N, L, H, D)
    v = v.reshape(N, L, H, D)
    q = q.reshape(N, L, H, D)
    energy = jnp.einsum('nqhd,nkhd->nhqk', q, k)
    if mask is not None:
        energy = jnp.where(mask == 0, -1e20, energy)
    attn = jax.nn.softmax(energy / math.sqrt(embed_size), axis=3)
    out = jnp.einsum('nhql,nlhd->nqhd', attn, v).reshape(N, L, H * D)
    return out @ wo + bo


if __name__ == "__main__":
    N, L, E, H = 2, 8, 32, 4

    key = jax.random.PRNGKey(0)
    ks = jax.random.split(key, 9)
    scale = 1.0 / math.sqrt(E)
    # PyTorch Linear weight is (out, in); pass transposed (in, out) so y = x @ W.
    wk = jax.random.uniform(ks[0], (E, E), jnp.float32, -scale, scale)
    wv = jax.random.uniform(ks[1], (E, E), jnp.float32, -scale, scale)
    wq = jax.random.uniform(ks[2], (E, E), jnp.float32, -scale, scale)
    wo = jax.random.uniform(ks[3], (E, E), jnp.float32, -scale, scale)
    bo = jax.random.uniform(ks[4], (E,), jnp.float32, -scale, scale)
    params = (wk, wv, wq, wo, bo)

    values = jax.random.normal(ks[5], (N, L, E), jnp.float32)
    keys_in = jax.random.normal(ks[6], (N, L, E), jnp.float32)
    queries = jax.random.normal(ks[7], (N, L, E), jnp.float32)

    # Causal mask, broadcast to (N, H, Q, K) as float {0, 1}.
    causal = jnp.tril(jnp.ones((L, L), jnp.float32))
    mask = jnp.broadcast_to(causal, (N, H, L, L))

    ref = reference_forward(values, keys_in, queries, mask, params, E, H)

    # bf16-MXU path (default): loose tolerance appropriate for bf16 operands.
    fwd_bf16 = make_self_attention(E, H, L, N)
    out_bf16 = jax.block_until_ready(fwd_bf16(values, keys_in, queries, mask, params))
    assert out_bf16.shape == (N, L, E)
    assert jnp.allclose(out_bf16, ref, atol=3e-2, rtol=3e-2), \
        f"bf16 path max abs err = {jnp.max(jnp.abs(out_bf16 - ref))}"

    # f32 path: tight tolerance (only the approximate EUP reciprocal differs).
    fwd_f32 = make_self_attention(E, H, L, N, compute_dtype=jnp.float32)
    out_f32 = jax.block_until_ready(fwd_f32(values, keys_in, queries, mask, params))
    assert jnp.allclose(out_f32, ref, atol=2e-3, rtol=2e-3), \
        f"f32 path max abs err = {jnp.max(jnp.abs(out_f32 - ref))}"

    print("KERNEL_OK")
</pallas_src>

<mosaic_0001>
module attributes {stable_mosaic.version = 11 : i64} {
  func.func @kernel(%arg0: i32, %arg1: memref<16x96xf32, #tpu.memory_space<vmem>>, %arg2: memref<16x16xf32, #tpu.memory_space<vmem>>, %arg3: memref<96x192xf32, #tpu.memory_space<vmem>>, %arg4: memref<1x32xf32, #tpu.memory_space<vmem>>, %arg5: memref<16x32xf32, #tpu.memory_space<vmem>>) attributes {dimension_semantics = [#tpu.dimension_semantics<arbitrary>], iteration_bounds = array<i64: 1>, scalar_prefetch = 0 : i64, scratch_operands = 0 : i64, tpu.core_type = #tpu.core_type<tc>, window_params = [{pipeline_mode = #tpu.pipeline_mode<synchronous>, transform_indices = @transform_0, window_bounds = array<i64: 16, 96>}, {pipeline_mode = #tpu.pipeline_mode<synchronous>, transform_indices = @transform_1, window_bounds = array<i64: 16, 16>}, {pipeline_mode = #tpu.pipeline_mode<synchronous>, transform_indices = @transform_2, window_bounds = array<i64: 96, 192>}, {pipeline_mode = #tpu.pipeline_mode<synchronous>, transform_indices = @transform_3, window_bounds = array<i64: 1, 32>}, {pipeline_mode = #tpu.pipeline_mode<synchronous>, transform_indices = @transform_4, window_bounds = array<i64: 16, 32>}]} {
    %c0 = arith.constant 0 : index
    %c0_0 = arith.constant 0 : index
    %0 = vector.load %arg1[%c0, %c0_0] : memref<16x96xf32, #tpu.memory_space<vmem>>, vector<16x96xf32>
    %1 = arith.truncf %0 : vector<16x96xf32> to vector<16x96xbf16>
    %c0_1 = arith.constant 0 : index
    %c0_2 = arith.constant 0 : index
    %2 = vector.load %arg3[%c0_1, %c0_2] : memref<96x192xf32, #tpu.memory_space<vmem>>, vector<96x192xf32>
    %3 = arith.truncf %2 : vector<96x192xf32> to vector<96x192xbf16>
    %cst = arith.constant dense<0.000000e+00> : vector<16x192xf32>
    %4 = tpu.matmul %1, %3, %cst {dimension_numbers = #tpu.dot_dimension_numbers<[1], [0], [0], [1], [0, 0, 1, 1], [], []>} : vector<16x96xbf16>, vector<96x192xbf16>, vector<16x192xf32> -> vector<16x192xf32>
    %c0_3 = arith.constant 0 : index
    %c0_4 = arith.constant 0 : index
    %5 = vector.load %arg2[%c0_3, %c0_4] : memref<16x16xf32, #tpu.memory_space<vmem>>, vector<16x16xf32>
    %c0_5 = arith.constant 0 : index
    %c0_6 = arith.constant 0 : index
    %6 = vector.load %arg4[%c0_5, %c0_6] : memref<1x32xf32, #tpu.memory_space<vmem>>, vector<1x32xf32>
    %7 = vector.shape_cast %6 : vector<1x32xf32> to vector<1x32xf32>
    %8 = vector.broadcast %7 : vector<1x32xf32> to vector<16x32xf32>
    %9 = vector.extract_strided_slice %4 {offsets = [0, 0], sizes = [16, 8], strides = [1, 1]} : vector<16x192xf32> to vector<16x8xf32>
    %10 = vector.extract_strided_slice %4 {offsets = [0, 8], sizes = [16, 8], strides = [1, 1]} : vector<16x192xf32> to vector<16x8xf32>
    %11 = arith.truncf %10 : vector<16x8xf32> to vector<16x8xbf16>
    %12 = arith.truncf %9 : vector<16x8xf32> to vector<16x8xbf16>
    %cst_7 = arith.constant dense<0.000000e+00> : vector<16x16xf32>
    %13 = tpu.matmul %11, %12, %cst_7 {dimension_numbers = #tpu.dot_dimension_numbers<[1], [1], [0], [0], [0, 0, 1, 0], [], []>} : vector<16x8xbf16>, vector<16x8xbf16>, vector<16x16xf32> -> vector<16x16xf32>
    %14 = arith.addf %13, %5 : vector<16x16xf32>
    %cst_8 = arith.constant dense<0xFF800000> : vector<16xf32>
    %15 = vector.multi_reduction <maximumf>, %14, %cst_8 [1] : vector<16x16xf32> to vector<16xf32>
    %16 = vector.shape_cast %15 : vector<16xf32> to vector<16x1xf32>
    %17 = vector.broadcast %16 : vector<16x1xf32> to vector<16x16xf32>
    %18 = arith.subf %14, %17 : vector<16x16xf32>
    %19 = math.exp %18 : vector<16x16xf32>
    %cst_9 = arith.constant dense<0.000000e+00> : vector<16xf32>
    %20 = vector.multi_reduction <add>, %19, %cst_9 [1] : vector<16x16xf32> to vector<16xf32>
    %21 = vector.shape_cast %20 : vector<16xf32> to vector<16x1xf32>
    %22 = tpu.reciprocal %21 {approx = true} : vector<16x1xf32> -> vector<16x1xf32>
    %23 = vector.broadcast %22 : vector<16x1xf32> to vector<16x16xf32>
    %24 = arith.mulf %19, %23 : vector<16x16xf32>
    %25 = vector.extract_strided_slice %4 {offsets = [0, 64], sizes = [16, 32], strides = [1, 1]} : vector<16x192xf32> to vector<16x32xf32>
    %26 = arith.truncf %24 : vector<16x16xf32> to vector<16x16xbf16>
    %27 = arith.truncf %25 : vector<16x32xf32> to vector<16x32xbf16>
    %cst_10 = arith.constant dense<0.000000e+00> : vector<16x32xf32>
    %28 = tpu.matmul %26, %27, %cst_10 {dimension_numbers = #tpu.dot_dimension_numbers<[1], [0], [0], [1], [0, 0, 1, 1], [], []>} : vector<16x16xbf16>, vector<16x32xbf16>, vector<16x32xf32> -> vector<16x32xf32>
    %29 = arith.addf %8, %28 : vector<16x32xf32>
    %30 = vector.extract_strided_slice %4 {offsets = [0, 16], sizes = [16, 8], strides = [1, 1]} : vector<16x192xf32> to vector<16x8xf32>
    %31 = vector.extract_strided_slice %4 {offsets = [0, 24], sizes = [16, 8], strides = [1, 1]} : vector<16x192xf32> to vector<16x8xf32>
    %32 = arith.truncf %31 : vector<16x8xf32> to vector<16x8xbf16>
    %33 = arith.truncf %30 : vector<16x8xf32> to vector<16x8xbf16>
    %cst_11 = arith.constant dense<0.000000e+00> : vector<16x16xf32>
    %34 = tpu.matmul %32, %33, %cst_11 {dimension_numbers = #tpu.dot_dimension_numbers<[1], [1], [0], [0], [0, 0, 1, 0], [], []>} : vector<16x8xbf16>, vector<16x8xbf16>, vector<16x16xf32> -> vector<16x16xf32>
    %35 = arith.addf %34, %5 : vector<16x16xf32>
    %cst_12 = arith.constant dense<0xFF800000> : vector<16xf32>
    %36 = vector.multi_reduction <maximumf>, %35, %cst_12 [1] : vector<16x16xf32> to vector<16xf32>
    %37 = vector.shape_cast %36 : vector<16xf32> to vector<16x1xf32>
    %38 = vector.broadcast %37 : vector<16x1xf32> to vector<16x16xf32>
    %39 = arith.subf %35, %38 : vector<16x16xf32>
    %40 = math.exp %39 : vector<16x16xf32>
    %cst_13 = arith.constant dense<0.000000e+00> : vector<16xf32>
    %41 = vector.multi_reduction <add>, %40, %cst_13 [1] : vector<16x16xf32> to vector<16xf32>
    %42 = vector.shape_cast %41 : vector<16xf32> to vector<16x1xf32>
    %43 = tpu.reciprocal %42 {approx = true} : vector<16x1xf32> -> vector<16x1xf32>
    %44 = vector.broadcast %43 : vector<16x1xf32> to vector<16x16xf32>
    %45 = arith.mulf %40, %44 : vector<16x16xf32>
    %46 = vector.extract_strided_slice %4 {offsets = [0, 96], sizes = [16, 32], strides = [1, 1]} : vector<16x192xf32> to vector<16x32xf32>
    %47 = arith.truncf %45 : vector<16x16xf32> to vector<16x16xbf16>
    %48 = arith.truncf %46 : vector<16x32xf32> to vector<16x32xbf16>
    %cst_14 = arith.constant dense<0.000000e+00> : vector<16x32xf32>
    %49 = tpu.matmul %47, %48, %cst_14 {dimension_numbers = #tpu.dot_dimension_numbers<[1], [0], [0], [1], [0, 0, 1, 1], [], []>} : vector<16x16xbf16>, vector<16x32xbf16>, vector<16x32xf32> -> vector<16x32xf32>
    %50 = arith.addf %29, %49 : vector<16x32xf32>
    %51 = vector.extract_strided_slice %4 {offsets = [0, 32], sizes = [16, 8], strides = [1, 1]} : vector<16x192xf32> to vector<16x8xf32>
    %52 = vector.extract_strided_slice %4 {offsets = [0, 40], sizes = [16, 8], strides = [1, 1]} : vector<16x192xf32> to vector<16x8xf32>
    %53 = arith.truncf %52 : vector<16x8xf32> to vector<16x8xbf16>
    %54 = arith.truncf %51 : vector<16x8xf32> to vector<16x8xbf16>
    %cst_15 = arith.constant dense<0.000000e+00> : vector<16x16xf32>
    %55 = tpu.matmul %53, %54, %cst_15 {dimension_numbers = #tpu.dot_dimension_numbers<[1], [1], [0], [0], [0, 0, 1, 0], [], []>} : vector<16x8xbf16>, vector<16x8xbf16>, vector<16x16xf32> -> vector<16x16xf32>
    %56 = arith.addf %55, %5 : vector<16x16xf32>
    %cst_16 = arith.constant dense<0xFF800000> : vector<16xf32>
    %57 = vector.multi_reduction <maximumf>, %56, %cst_16 [1] : vector<16x16xf32> to vector<16xf32>
    %58 = vector.shape_cast %57 : vector<16xf32> to vector<16x1xf32>
    %59 = vector.broadcast %58 : vector<16x1xf32> to vector<16x16xf32>
    %60 = arith.subf %56, %59 : vector<16x16xf32>
    %61 = math.exp %60 : vector<16x16xf32>
    %cst_17 = arith.constant dense<0.000000e+00> : vector<16xf32>
    %62 = vector.multi_reduction <add>, %61, %cst_17 [1] : vector<16x16xf32> to vector<16xf32>
    %63 = vector.shape_cast %62 : vector<16xf32> to vector<16x1xf32>
    %64 = tpu.reciprocal %63 {approx = true} : vector<16x1xf32> -> vector<16x1xf32>
    %65 = vector.broadcast %64 : vector<16x1xf32> to vector<16x16xf32>
    %66 = arith.mulf %61, %65 : vector<16x16xf32>
    %67 = vector.extract_strided_slice %4 {offsets = [0, 128], sizes = [16, 32], strides = [1, 1]} : vector<16x192xf32> to vector<16x32xf32>
    %68 = arith.truncf %66 : vector<16x16xf32> to vector<16x16xbf16>
    %69 = arith.truncf %67 : vector<16x32xf32> to vector<16x32xbf16>
    %cst_18 = arith.constant dense<0.000000e+00> : vector<16x32xf32>
    %70 = tpu.matmul %68, %69, %cst_18 {dimension_numbers = #tpu.dot_dimension_numbers<[1], [0], [0], [1], [0, 0, 1, 1], [], []>} : vector<16x16xbf16>, vector<16x32xbf16>, vector<16x32xf32> -> vector<16x32xf32>
    %71 = arith.addf %50, %70 : vector<16x32xf32>
    %72 = vector.extract_strided_slice %4 {offsets = [0, 48], sizes = [16, 8], strides = [1, 1]} : vector<16x192xf32> to vector<16x8xf32>
    %73 = vector.extract_strided_slice %4 {offsets = [0, 56], sizes = [16, 8], strides = [1, 1]} : vector<16x192xf32> to vector<16x8xf32>
    %74 = arith.truncf %73 : vector<16x8xf32> to vector<16x8xbf16>
    %75 = arith.truncf %72 : vector<16x8xf32> to vector<16x8xbf16>
    %cst_19 = arith.constant dense<0.000000e+00> : vector<16x16xf32>
    %76 = tpu.matmul %74, %75, %cst_19 {dimension_numbers = #tpu.dot_dimension_numbers<[1], [1], [0], [0], [0, 0, 1, 0], [], []>} : vector<16x8xbf16>, vector<16x8xbf16>, vector<16x16xf32> -> vector<16x16xf32>
    %77 = arith.addf %76, %5 : vector<16x16xf32>
    %cst_20 = arith.constant dense<0xFF800000> : vector<16xf32>
    %78 = vector.multi_reduction <maximumf>, %77, %cst_20 [1] : vector<16x16xf32> to vector<16xf32>
    %79 = vector.shape_cast %78 : vector<16xf32> to vector<16x1xf32>
    %80 = vector.broadcast %79 : vector<16x1xf32> to vector<16x16xf32>
    %81 = arith.subf %77, %80 : vector<16x16xf32>
    %82 = math.exp %81 : vector<16x16xf32>
    %cst_21 = arith.constant dense<0.000000e+00> : vector<16xf32>
    %83 = vector.multi_reduction <add>, %82, %cst_21 [1] : vector<16x16xf32> to vector<16xf32>
    %84 = vector.shape_cast %83 : vector<16xf32> to vector<16x1xf32>
    %85 = tpu.reciprocal %84 {approx = true} : vector<16x1xf32> -> vector<16x1xf32>
    %86 = vector.broadcast %85 : vector<16x1xf32> to vector<16x16xf32>
    %87 = arith.mulf %82, %86 : vector<16x16xf32>
    %88 = vector.extract_strided_slice %4 {offsets = [0, 160], sizes = [16, 32], strides = [1, 1]} : vector<16x192xf32> to vector<16x32xf32>
    %89 = arith.truncf %87 : vector<16x16xf32> to vector<16x16xbf16>
    %90 = arith.truncf %88 : vector<16x32xf32> to vector<16x32xbf16>
    %cst_22 = arith.constant dense<0.000000e+00> : vector<16x32xf32>
    %91 = tpu.matmul %89, %90, %cst_22 {dimension_numbers = #tpu.dot_dimension_numbers<[1], [0], [0], [1], [0, 0, 1, 1], [], []>} : vector<16x16xbf16>, vector<16x32xbf16>, vector<16x32xf32> -> vector<16x32xf32>
    %92 = arith.addf %71, %91 : vector<16x32xf32>
    %c0_23 = arith.constant 0 : index
    %c0_24 = arith.constant 0 : index
    %93 = vector.load %arg5[%c0_23, %c0_24] : memref<16x32xf32, #tpu.memory_space<vmem>>, vector<16x32xf32>
    tpu.vector_store %arg5[%c0_23, %c0_24], %92 {strides = array<i32>} : memref<16x32xf32, #tpu.memory_space<vmem>>, vector<16x32xf32>,
    return
  }
  func.func @transform_0(%arg0: i32) -> (i32, i32) {
    %c0_i32 = arith.constant 0 : i32
    %c0_i32_0 = arith.constant 0 : i32
    %c0_i32_1 = arith.constant 0 : i32
    return %c0_i32, %c0_i32_0 : i32, i32
  }
  func.func @transform_1(%arg0: i32) -> (i32, i32) {
    %c0_i32 = arith.constant 0 : i32
    %c0_i32_0 = arith.constant 0 : i32
    %c0_i32_1 = arith.constant 0 : i32
    return %c0_i32, %c0_i32_0 : i32, i32
  }
  func.func @transform_2(%arg0: i32) -> (i32, i32) {
    %c0_i32 = arith.constant 0 : i32
    %c0_i32_0 = arith.constant 0 : i32
    %c0_i32_1 = arith.constant 0 : i32
    return %c0_i32, %c0_i32_0 : i32, i32
  }
  func.func @transform_3(%arg0: i32) -> (i32, i32) {
    %c0_i32 = arith.constant 0 : i32
    %c0_i32_0 = arith.constant 0 : i32
    %c0_i32_1 = arith.constant 0 : i32
    return %c0_i32, %c0_i32_0 : i32, i32
  }
  func.func @transform_4(%arg0: i32) -> (i32, i32) {
    %c0_i32 = arith.constant 0 : i32
    %c0_i32_0 = arith.constant 0 : i32
    %c0_i32_1 = arith.constant 0 : i32
    return %c0_i32, %c0_i32_0 : i32, i32
  }
}

</mosaic_0001>

<bundles_post_ra>
// kernel: forward.1
= control target key start
LH: loop header
LB: loop body
LE: loop exit
PB: predicated region body
PF: predicated region fallthrough
CT: control target
= control target key end

     0   :  { %v769_v7 = vmov 0   ;;  %s986_s0 = inlined_call_operand.vmem [shape: f32[16,96], index: 0, kind: input, shape index: {}]   ;;  %s987_s1 = inlined_call_operand.vmem [shape: f32[16,16], index: 1, kind: input, shape index: {}]   ;;  %s988_s2 = inlined_call_operand.vmem [shape: f32[96,192], index: 2, kind: input, shape index: {}]   ;;  %s989_s3 = inlined_call_operand.vmem [shape: f32[1,32], index: 3, kind: input, shape index: {}]   ;;  %s990_s4 = inlined_call_operand.hbm [shape: f32[16,32], index: 4, kind: output, shape index: {}]  }
   0x1   :  { %v43_v0 = vld [vmem:[%s988_s2 + $0xa8] sm:$0xff]  ;;  %v45_v1 = vld [vmem:[%s988_s2 + $0xb8] sm:$0xff]  ;;  %v42_v2 = vld [vmem:[%s988_s2 + $0xa0] sm:$0xff]  ;;  %94 = vmatprep.mubr.bf16.mxu0 %v769_v7 }
   0x2   :  { %v57_v3 = vpack.c.bf16 %v45_v1, %v43_v0  ;;  %v44_v4 = vld [vmem:[%s988_s2 + $0xb0] sm:$0xff]  ;;  %v39_v5 = vld [vmem:[%s988_s2 + $0x88] sm:$0xff]  ;;  %v41_v6 = vld [vmem:[%s988_s2 + $0x98] sm:$0xff] }
   0x3   :  { %v56_v8 = vpack.c.bf16 %v44_v4, %v42_v2  ;;  %v55_v9 = vpack.c.bf16 %v41_v6, %v39_v5  ;;  %v38_v10 = vld [vmem:[%s988_s2 + $0x80] sm:$0xff]  ;;  %v40_v11 = vld [vmem:[%s988_s2 + $0x90] sm:$0xff]  ;;  %v35_v12 = vld [vmem:[%s988_s2 + $0x68] sm:$0xff] }
   0x4   :  { %66 = vmatprep.subr.bf16.mxu0 %v57_v3  ;;  %v37_v13 = vld [vmem:[%s988_s2 + $0x78] sm:$0xff]  ;;  %v54_v14 = vpack.c.bf16 %v40_v11, %v38_v10  ;;  %v34_v16 = vld [vmem:[%s988_s2 + $0x60] sm:$0xff]  ;;  %v36_v17 = vld [vmem:[%s988_s2 + $0x70] sm:$0xff] }
   0x5   :  { %67 = vmatpush1.bf16.msra.mxu0 %v56_v8  ;;  %v53_v15 = vpack.c.bf16 %v37_v13, %v35_v12  ;;  %v31_v18 = vld [vmem:[%s988_s2 + $0x48] sm:$0xff]  ;;  %v33_v19 = vld [vmem:[%s988_s2 + $0x58] sm:$0xff]  ;;  %v52_v20 = vpack.c.bf16 %v36_v17, %v34_v16 }
   0x6   :  { %68 = vmatprep.subr.bf16.mxu0 %v55_v9 }
   0x9   :  { %69 = vmatpush1.bf16.msra.mxu0 %v54_v14 }
   0xa   :  { %9 = vsyncpa [#allocation3], 0  ;;  %70 = vmatprep.subr.bf16.mxu0 %v53_v15  ;;  %v51_v21 = vpack.c.bf16 %v33_v19, %v31_v18  ;;  %v30_v22 = vld [vmem:[%s988_s2 + $0x40] sm:$0xff]  ;;  %v32_v23 = vld [vmem:[%s988_s2 + $0x50] sm:$0xff]  ;;  %vm58_vm0 = vcmask 785408   ;;  %v770_v40 = vmov 0.0  }
   0xb   :  { %v27_v24 = vld [vmem:[%s988_s2 + $0x28] sm:$0xff]  ;;  %v29_v25 = vld [vmem:[%s988_s2 + $0x38] sm:$0xff]  ;;  %v50_v26 = vpack.c.bf16 %v32_v23, %v30_v22  ;;  %v26_v28 = vld [vmem:[%s988_s2 + $0x20] sm:$0xff]  ;;  %652 = vmatprep.subr.bf16.mxu1 %v770_v40  ;;  %vm771_vm1 = vmmov 0   ;;  %vm118_vm2 = vcmask 64512   ;;  %vm166_vm3 = vcmask 130048  }
   0xc   :  { %v49_v27 = vpack.c.bf16 %v29_v25, %v27_v24  ;;  %v28_v29 = vld [vmem:[%s988_s2 + $0x30] sm:$0xff]  ;;  %v23_v30 = vld [vmem:[%s988_s2 + $0x8] sm:$0xff]  ;;  %v25_v31 = vld [vmem:[%s988_s2 + $0x18] sm:$0xff]  ;;  %654 = vmatprep.mubr.msk.bf16.mxu1 %vm771_vm1, %v770_v40  ;;  %s773_s18 = smov 64   ;;  %s774_s19 = smov 96   ;;  %vm607_vm4 = vcmask 261120  }
   0xd   :  { %71 = vmatpush1.bf16.msra.mxu0 %v52_v20  ;;  %v48_v32 = vpack.c.bf16 %v28_v29, %v26_v28  ;;  %v47_v33 = vpack.c.bf16 %v25_v31, %v23_v30  ;;  %v22_v34 = vld [vmem:[%s988_s2] sm:$0xff]  ;;  %v24_v35 = vld [vmem:[%s988_s2 + $0x10] sm:$0xff]  ;;  %v20_v38 = vld [vmem:[%s986_s0 + $0x8] sm:$0xff]  ;;  %s776_s20 = smov 104   ;;  %s777_s21 = smov 88  }
   0xe   :  { %72 = vmatprep.subr.bf16.mxu0 %v51_v21  ;;  %v46_v36 = vpack.c.bf16 %v24_v35, %v22_v34  ;;  %v19_v37 = vld [vmem:[%s986_s0] sm:$0xff]  ;;  %s772_s0 = smov 120   ;;  %v913_v51 = vld [vmem:[%s987_s1 + $0x8] sm:$0xff]  ;;  %s778_s22 = smov 80  }
   0xf   :  { %v21_v39 = vpack.c.bf16 %v20_v38, %v19_v37  ;;  %v907_v47 = vld [vmem:[%s987_s1] sm:$0xff]  ;;  %s775_s1 = smov 112   ;;  %s779_s23 = smov 72  }
  0x10   :  { %s780_s24 = smov 32   ;;  %s781_s27 = smov [#allocation2]  }
  0x11   :  { %73 = vmatpush1.bf16.msra.mxu0 %v50_v26  ;;  %s615_s28 = sshll.u32 %s781_s27, 4  ;;  %s616_s28 = int_to_ptr.vmem [resolvable:$true] %s615_s28 }
  0x12   :  { %74 = vmatprep.subr.bf16.mxu0 %v49_v27  ;;  %p752_p1 = scmp.lt.s32.totalorder %s616_s28, %s616_s28 }
  0x15   :  { %75 = vmatpush1.bf16.msra.mxu0 %v48_v32 }
  0x16   :  { %76 = vmatprep.subr.bf16.mxu0 %v47_v33 }
  0x19   :  { %77 = vmatpush1.bf16.msra.mxu0 %v46_v36 }
  0x1a   :  { %670 = vmatprep.subr.bf16.mxu0 %v770_v40 }
  0x1c   :  { %626 = vmatmul.mubr.msk.bf16.vlgmr.msra.gmra.mxu0 %vm58_vm0, %v21_v39 }
  0x1d   :  { %672 = vmatprep.mubr.msk.bf16.mxu0 %vm771_vm1, %v770_v40 }
  0xdc   :  { %v96_v41 = vpop.f32.mrf.mxu0 }
  0xde   :  { %v893_v42 = vpop.f32.mrf.mxu0 }
  0xe0   :  { %v100_v43 = vpop.f32.mrf.mxu0 }
  0xe1   :  { %v895_v44 = vpack.c.bf16 %v100_v43, %v96_v41 }
  0xe3   :  { %116 = vrot.lane.b32.xlu0 %v895_v44, %s772_s0  ;;  %v123_v45 = vsel %vm118_vm2, %v895_v44, 0 }
  0xe4   :  { %653 = vmatpush3.bf16.xpose.msra.mxu1 %v123_v45 }
  0xe5   :  { %658 = vmatprep.subr.bf16.mxu1 %v770_v40 }
 0x155   :  { %v117_v46 = vpop.permute.xlu0 %116 }
 0x156   :  { %655 = vmatmul.mubr.msk.bf16.vlgmr.msra.gmra.mxu1 %vm118_vm2, %v117_v46 }
 0x157   :  { %660 = vmatprep.mubr.msk.bf16.mxu1 %vm771_vm1, %v770_v40 }
 0x216   :  { %v159_v48 = vpop.f32.mrf.mxu1 }
 0x217   :  { %v160_v49 = vadd.f32 %v159_v48, %v907_v47 }
 0x218   :  { %v656_v50 = vpop.f32.mrf.mxu1 }
 0x219   :  { %v167_v52 = vsel %vm166_vm3, %v160_v49, -inf }
 0x21a   :  { %168 = vmax.xlane.f32.xlu0 %v167_v52  ;;  %v162_v53 = vpop.f32.mrf.mxu1 }
 0x21b   :  { %v163_v54 = vadd.f32 %v162_v53, %v913_v51 }
 0x21c   :  { %v657_v55 = vpop.f32.mrf.mxu1 }
 0x21d   :  { %v170_v56 = vsel %vm166_vm3, %v163_v54, -inf }
 0x21e   :  { %171 = vmax.xlane.f32.xlu1 %v170_v56 }
 0x22f   :  { %190 = vrot.lane.b32.xlu1 %v895_v44, %s773_s18 }
 0x230   :  { %364 = vrot.lane.b32.xlu0 %v895_v44, %s774_s19 }
 0x2a3   :  { %v169_v57 = vpop.xlane.xlu0 %168 }
 0x2a4   :  { %v173_v58 = vsub.f32 %v160_v49, %v169_v57 }
 0x2a6   :  { %v175_v59 = vmul.f32 1.442695, %v173_v58 }
 0x2a7   :  { %v172_v60 = vpop.xlane.xlu1 %171  ;;  %v365_v14 = vpop.permute.xlu0 %364 }
 0x2a8   :  { %715 = vpow2.f32 %v175_v59  ;;  %v174_v61 = vsub.f32 %v163_v54, %v172_v60  ;;  %v370_v16 = vsel %vm118_vm2, %v365_v14, 0 }
 0x2aa   :  { %v177_v62 = vmul.f32 1.442695, %v174_v61 }
 0x2ab   :  { %v191_v63 = vpop.permute.xlu1 %190 }
 0x2ac   :  { %717 = vpow2.f32 %v177_v62  ;;  %659 = vmatpush3.bf16.msra.mxu1 %v191_v63 }
 0x2ad   :  { %664 = vmatprep.subr.bf16.mxu1 %v770_v40 }
 0x2b5   :  { %v716_v0 = vpop.eup %715 }
 0x2b6   :  { %v179_v1 = vsel %vm166_vm3, %v716_v0, 0.0 }
 0x2b7   :  { %180 = vadd.xlane.f32.xlu1 %v179_v1 }
 0x2b9   :  { %v718_v2 = vpop.eup %717 }
 0x2ba   :  { %v182_v3 = vsel %vm166_vm3, %v718_v2, 0.0 }
 0x2bb   :  { %183 = vadd.xlane.f32.xlu1 %v182_v3 }
 0x2cc   :  { %241 = vrot.lane.b32.xlu1 %v895_v44, %s775_s1 }
 0x2d0   :  { %239 = vrot.lane.b32.xlu1 %v895_v44, %s776_s20 }
 0x2d4   :  { %362 = vrot.lane.b32.xlu1 %v895_v44, %s777_s21 }
 0x2d8   :  { %485 = vrot.lane.b32.xlu1 %v895_v44, %s778_s22 }
 0x2dc   :  { %483 = vrot.lane.b32.xlu1 %v895_v44, %s779_s23 }
 0x340   :  { %v181_v4 = vpop.xlane.xlu1 %180 }
 0x341   :  { %719 = vrcp.f32 %v181_v4 }
 0x344   :  { %v184_v5 = vpop.xlane.xlu1 %183 }
 0x345   :  { %721 = vrcp.f32 %v184_v5 }
 0x348   :  { %v242_v8 = vpop.permute.xlu1 %241 }
 0x349   :  { %v247_v12 = vsel %vm118_vm2, %v242_v8, 0 }
 0x34c   :  { %v240_v13 = vpop.permute.xlu1 %239 }
 0x34e   :  { %v720_v6 = vpop.eup %719 }
 0x34f   :  { %v187_v9 = vmul.f32 %v720_v6, %v716_v0 }
 0x350   :  { %v363_v15 = vpop.permute.xlu1 %362 }
 0x352   :  { %v722_v7 = vpop.eup %721 }
 0x353   :  { %v188_v10 = vmul.f32 %v722_v7, %v718_v2 }
 0x354   :  { %v486_v17 = vpop.permute.xlu1 %485 }
 0x355   :  { %v189_v11 = vpack.c.bf16 %v188_v10, %v187_v9  ;;  %v491_v18 = vsel %vm118_vm2, %v486_v17, 0  ;;  %v102_v17 = vpop.f32.mrf.mxu0 }
 0x357   :  { %661 = vmatmul.mubr.msk.bf16.vlgmr.msra.gmra.mxu1 %vm166_vm3, %v189_v11 }
 0x358   :  { %665 = vmatpush3.bf16.xpose.msra.mxu1 %v247_v12  ;;  %666 = vmatprep.mubr.msk.bf16.mxu1 %vm771_vm1, %v770_v40  ;;  %v484_v19 = vpop.permute.xlu1 %483 }
 0x359   :  { %676 = vmatprep.subr.bf16.mxu1 %v770_v40 }
 0x35f   :  { %667 = vmatmul.mubr.msk.bf16.vlgmr.msra.gmra.mxu1 %vm118_vm2, %v240_v13 }
 0x360   :  { %677 = vmatpush3.bf16.xpose.msra.mxu1 %v370_v16  ;;  %678 = vmatprep.mubr.msk.bf16.mxu1 %vm771_vm1, %v770_v40 }
 0x361   :  { %688 = vmatprep.subr.bf16.mxu1 %v770_v40 }
 0x367   :  { %679 = vmatmul.mubr.msk.bf16.vlgmr.msra.gmra.mxu1 %vm118_vm2, %v363_v15 }
 0x368   :  { %689 = vmatpush3.bf16.xpose.msra.mxu1 %v491_v18  ;;  %690 = vmatprep.mubr.msk.bf16.mxu1 %vm771_vm1, %v770_v40  ;;  %v436_v18 = vpack.c.bf16 %v102_v17, %v893_v42 }
 0x36f   :  { %691 = vmatmul.mubr.msk.bf16.vlgmr.msra.gmra.mxu1 %vm118_vm2, %v484_v19 }
 0x417   :  { %v944_v20 = vpop.f32.mrf.mxu1 }
 0x419   :  { %v662_v21 = vpop.f32.mrf.mxu1 }
 0x41b   :  { %v946_v22 = vpop.f32.mrf.mxu1 }
 0x41d   :  { %v663_v23 = vpop.f32.mrf.mxu1 }
 0x41f   :  { %v283_v24 = vpop.f32.mrf.mxu1 }
 0x420   :  { %v284_v25 = vadd.f32 %v283_v24, %v907_v47 }
 0x421   :  { %v668_v26 = vpop.f32.mrf.mxu1 }
 0x422   :  { %v290_v27 = vsel %vm166_vm3, %v284_v25, -inf }
 0x423   :  { %291 = vmax.xlane.f32.xlu1 %v290_v27  ;;  %v286_v28 = vpop.f32.mrf.mxu1 }
 0x424   :  { %v287_v29 = vadd.f32 %v286_v28, %v913_v51 }
 0x425   :  { %v669_v30 = vpop.f32.mrf.mxu1 }
 0x426   :  { %v293_v31 = vsel %vm166_vm3, %v287_v29, -inf }
 0x427   :  { %294 = vmax.xlane.f32.xlu0 %v293_v31  ;;  %v406_v32 = vpop.f32.mrf.mxu1 }
 0x428   :  { %v407_v33 = vadd.f32 %v406_v32, %v907_v47 }
 0x429   :  { %v680_v34 = vpop.f32.mrf.mxu1 }
 0x42a   :  { %v413_v35 = vsel %vm166_vm3, %v407_v33, -inf }
 0x42b   :  { %414 = vmax.xlane.f32.xlu1 %v413_v35  ;;  %v409_v36 = vpop.f32.mrf.mxu1 }
 0x42c   :  { %v410_v37 = vadd.f32 %v409_v36, %v913_v51 }
 0x42d   :  { %v681_v38 = vpop.f32.mrf.mxu1 }
 0x42e   :  { %v416_v39 = vsel %vm166_vm3, %v410_v37, -inf }
 0x42f   :  { %417 = vmax.xlane.f32.xlu0 %v416_v39  ;;  %v527_v41 = vpop.f32.mrf.mxu1 }
 0x430   :  { %v528_v43 = vadd.f32 %v527_v41, %v907_v47 }
 0x431   :  { %v692_v45 = vpop.f32.mrf.mxu1 }
 0x432   :  { %v534_v46 = vsel %vm166_vm3, %v528_v43, -inf }
 0x433   :  { %535 = vmax.xlane.f32.xlu1 %v534_v46  ;;  %v530_v48 = vpop.f32.mrf.mxu1 }
 0x434   :  { %v531_v49 = vadd.f32 %v530_v48, %v913_v51 }
 0x435   :  { %v693_v50 = vpop.f32.mrf.mxu1 }
 0x436   :  { %v537_v52 = vsel %vm166_vm3, %v531_v49, -inf  ;;  %v627_v50 = vld [vmem:[%s989_s3] ss:$0 sm:$0xff]  ;;  %s747_s3 = scalar_lea.vmem %s616_s28, 256 }
 0x437   :  { %538 = vmax.xlane.f32.xlu0 %v537_v52  ;;  %p748_p0 = scmp.ne.s32.totalorder %s616_s28, %s747_s3  ;;  %p753_p2 = scmp.lt.s32.totalorder %s747_s3, %s747_s3 }
 0x439   :  { %p754_p3 = por %p753_p2, %p752_p1 }
 0x43b   :  { %p755_p4 = pnand %p754_p3, %p748_p0 }
 0x4ac   :  { %v292_v53 = vpop.xlane.xlu1 %291 }
 0x4ad   :  { %v296_v54 = vsub.f32 %v284_v25, %v292_v53 }
 0x4af   :  { %v298_v55 = vmul.f32 1.442695, %v296_v54  ;;  %v237_v54 = vadd.f32 %v627_v50, %v944_v20 }
 0x4b0   :  { %v295_v56 = vpop.xlane.xlu0 %294 }
 0x4b1   :  { %723 = vpow2.f32 %v298_v55  ;;  %v297_v57 = vsub.f32 %v287_v29, %v295_v56 }
 0x4b3   :  { %v300_v58 = vmul.f32 1.442695, %v297_v57  ;;  %v238_v57 = vadd.f32 %v627_v50, %v946_v22 }
 0x4b4   :  { %v415_v59 = vpop.xlane.xlu1 %414 }
 0x4b5   :  { %725 = vpow2.f32 %v300_v58  ;;  %v419_v47 = vsub.f32 %v407_v33, %v415_v59 }
 0x4b7   :  { %v421_v60 = vmul.f32 1.442695, %v419_v47 }
 0x4b8   :  { %v418_v61 = vpop.xlane.xlu0 %417 }
 0x4b9   :  { %727 = vpow2.f32 %v421_v60  ;;  %v420_v62 = vsub.f32 %v410_v37, %v418_v61 }
 0x4bb   :  { %v423_v63 = vmul.f32 1.442695, %v420_v62 }
 0x4bc   :  { %v536_v51 = vpop.xlane.xlu1 %535 }
 0x4bd   :  { %729 = vpow2.f32 %v423_v63  ;;  %v540_v0 = vsub.f32 %v528_v43, %v536_v51 }
 0x4be   :  { %v724_v1 = vpop.eup %723 }
 0x4bf   :  { %v542_v2 = vmul.f32 1.442695, %v540_v0  ;;  %v302_v3 = vsel %vm166_vm3, %v724_v1, 0.0 }
 0x4c0   :  { %303 = vadd.xlane.f32.xlu1 %v302_v3  ;;  %v539_v4 = vpop.xlane.xlu0 %538 }
 0x4c1   :  { %731 = vpow2.f32 %v542_v2  ;;  %v541_v5 = vsub.f32 %v531_v49, %v539_v4 }
 0x4c2   :  { %v726_v6 = vpop.eup %725 }
 0x4c3   :  { %v544_v7 = vmul.f32 1.442695, %v541_v5  ;;  %v305_v8 = vsel %vm166_vm3, %v726_v6, 0.0 }
 0x4c4   :  { %306 = vadd.xlane.f32.xlu0 %v305_v8 }
 0x4c5   :  { %733 = vpow2.f32 %v544_v7 }
 0x4c6   :  { %v728_v9 = vpop.eup %727 }
 0x4c7   :  { %v425_v10 = vsel %vm166_vm3, %v728_v9, 0.0 }
 0x4c8   :  { %426 = vadd.xlane.f32.xlu1 %v425_v10 }
 0x4ca   :  { %v730_v11 = vpop.eup %729 }
 0x4cb   :  { %v428_v12 = vsel %vm166_vm3, %v730_v11, 0.0 }
 0x4cc   :  { %429 = vadd.xlane.f32.xlu0 %v428_v12 }
 0x4ce   :  { %v732_v13 = vpop.eup %731 }
 0x4cf   :  { %v546_v14 = vsel %vm166_vm3, %v732_v13, 0.0 }
 0x4d0   :  { %547 = vadd.xlane.f32.xlu1 %v546_v14 }
 0x4d2   :  { %v734_v15 = vpop.eup %733 }
 0x4d3   :  { %v549_v16 = vsel %vm166_vm3, %v734_v15, 0.0 }
 0x4d4   :  { %550 = vadd.xlane.f32.xlu0 %v549_v16 }
 0x4e1   :  { %313 = vrot.lane.b32.xlu1 %v895_v44, %s780_s24 }
 0x4ea   :  { %558 = vrot.lane.b32.xlu0 %v436_v18, %s774_s19 }
 0x549   :  { %v304_v19 = vpop.xlane.xlu1 %303 }
 0x54a   :  { %735 = vrcp.f32 %v304_v19 }
 0x54d   :  { %v307_v21 = vpop.xlane.xlu0 %306 }
 0x54e   :  { %737 = vrcp.f32 %v307_v21 }
 0x551   :  { %v427_v23 = vpop.xlane.xlu1 %426 }
 0x552   :  { %739 = vrcp.f32 %v427_v23 }
 0x555   :  { %v430_v24 = vpop.xlane.xlu0 %429 }
 0x556   :  { %741 = vrcp.f32 %v430_v24 }
 0x557   :  { %v736_v25 = vpop.eup %735 }
 0x558   :  { %v310_v28 = vmul.f32 %v736_v25, %v724_v1 }
 0x559   :  { %v548_v26 = vpop.xlane.xlu1 %547 }
 0x55a   :  { %743 = vrcp.f32 %v548_v26 }
 0x55b   :  { %v738_v27 = vpop.eup %737 }
 0x55c   :  { %v311_v29 = vmul.f32 %v738_v27, %v726_v6 }
 0x55d   :  { %v314_v44 = vpop.permute.xlu1 %313  ;;  %v551_v30 = vpop.xlane.xlu0 %550 }
 0x55e   :  { %745 = vrcp.f32 %v551_v30  ;;  %671 = vmatpush3.bf16.msra.mxu0 %v314_v44  ;;  %v312_v42 = vpack.c.bf16 %v311_v29, %v310_v28 }
 0x55f   :  { %682 = vmatprep.subr.bf16.mxu0 %v770_v40  ;;  %v740_v31 = vpop.eup %739 }
 0x560   :  { %v433_v33 = vmul.f32 %v740_v31, %v728_v9 }
 0x561   :  { %673 = vmatmul.mubr.msk.bf16.vlgmr.msra.gmra.mxu0 %vm166_vm3, %v312_v42  ;;  %v559_v37 = vpop.permute.xlu0 %558 }
 0x562   :  { %683 = vmatpush3.bf16.msra.mxu0 %v436_v18  ;;  %684 = vmatprep.mubr.msk.bf16.mxu0 %vm771_vm1, %v770_v40 }
 0x563   :  { %v742_v32 = vpop.eup %741  ;;  %694 = vmatprep.subr.bf16.mxu0 %v770_v40 }
 0x564   :  { %v434_v34 = vmul.f32 %v742_v32, %v730_v11 }
 0x566   :  { %v435_v35 = vpack.c.bf16 %v434_v34, %v433_v33 }
 0x567   :  { %v744_v36 = vpop.eup %743 }
 0x568   :  { %v554_v39 = vmul.f32 %v744_v36, %v732_v13 }
 0x569   :  { %685 = vmatmul.mubr.msk.bf16.vlgmr.msra.gmra.mxu0 %vm166_vm3, %v435_v35 }
 0x56a   :  { %695 = vmatpush3.bf16.msra.mxu0 %v559_v37  ;;  %696 = vmatprep.mubr.msk.bf16.mxu0 %vm771_vm1, %v770_v40 }
 0x56b   :  { %v746_v38 = vpop.eup %745 }
 0x56c   :  { %v555_v41 = vmul.f32 %v746_v38, %v734_v15 }
 0x56e   :  { %v556_v43 = vpack.c.bf16 %v555_v41, %v554_v39 }
 0x571   :  { %697 = vmatmul.mubr.msk.bf16.vlgmr.msra.gmra.mxu0 %vm166_vm3, %v556_v43 }
 0x621   :  { %v353_v45 = vpop.f32.mrf.mxu0 }
 0x622   :  { %v360_v40 = vadd.f32 %v353_v45, %v237_v54 }
 0x623   :  { %v674_v46 = vpop.f32.mrf.mxu0 }
 0x625   :  { %v356_v48 = vpop.f32.mrf.mxu0 }
 0x626   :  { %v361_v47 = vadd.f32 %v356_v48, %v238_v57 }
 0x627   :  { %v675_v49 = vpop.f32.mrf.mxu0 }
 0x629   :  { %v474_v52 = vpop.f32.mrf.mxu0 }
 0x62a   :  { %v481_v58 = vadd.f32 %v474_v52, %v360_v40 }
 0x62b   :  { %v686_v53 = vpop.f32.mrf.mxu0 }
 0x62d   :  { %v477_v55 = vpop.f32.mrf.mxu0 }
 0x62e   :  { %v482_v62 = vadd.f32 %v477_v55, %v361_v47 }
 0x62f   :  { %v687_v56 = vpop.f32.mrf.mxu0 }
 0x631   :  { %v598_v59 = vpop.f32.mrf.mxu0 }
 0x632   :  { %v605_v60 = vadd.f32 %v598_v59, %v481_v58 }
 0x633   :  { %v698_v61 = vpop.f32.mrf.mxu0 }
 0x634   :  { %608 = vst.msk [vmem:[#allocation2] sm:$0xff] %vm607_vm4, %v605_v60 }
 0x635   :  { %v601_v63 = vpop.f32.mrf.mxu0 }
 0x636   :  { %v606_v51 = vadd.f32 %v601_v63, %v482_v62 }
 0x637   :  { %v699_v0 = vpop.f32.mrf.mxu0 }
 0x638   :  { %609 = vst.msk [vmem:[#allocation2 + $0x8] sm:$0xff] %vm607_vm4, %v606_v51 }
 0x639   :  { %758 = shalt.err (!%p755_p4)
}
 0x63a   :  { %s782_s29 = smov 128   ;;  %s783_s30 = smov 8  }
 0x63b   :  { %621 = dma.vmem_to_hbm [thread:$0]  %s616_s28, 256, %s990_s4, [#allocation3], %s782_s29, %s782_s29, %s783_s30  }
 0x63c   :  { %767 = dma.done.wait [#allocation3], 256  }
 0x63d   :  { %768 = vsyncadd [#allocation3], 4294967040 }
 0x63e   :  { %625 = vsyncpa [#allocation3], 1 }

</bundles_post_ra>
